<compile_context>
chip_gen: v5e
topology: v5e:2x2
jax: 0.10.0
libtpu: 0.0.40
codegen_flags: <defaults>
</compile_context>

<pallas_src>
import jax
import jax.numpy as jnp
from jax.experimental import pallas as pl
from jax.experimental.pallas import tpu as pltpu


def orthid_head_kernel(fp_ref, f1p_ref,
                       wp1t_ref, wp1b_ref, bp1_ref, wp2_ref, bp2_ref,
                       wi1t_ref, wi1b_ref, bi1_ref, wi2_ref, bi2_ref,
                       wc1_ref, bc1_ref, wc2_ref, bc2_ref,
                       pred_ref, fpad_ref, fid_ref, fidn_ref, norm_ref,
                       hc_ref):
    f32 = jnp.float32
    bf16 = jnp.bfloat16
    j = pl.program_id(1)  # class-column block index

    # Heads / norm do not depend on the class-column axis: compute them once per
    # batch tile (j == 0), write those outputs, and stash the classification
    # hidden activation (post-ReLU) in VMEM scratch for the per-column GEMMs.
    @pl.when(j == 0)
    def _():
        fb = fp_ref[...]    # (TB, C) bf16, pooled upstream in XLA (f32 accumulation)
        f1b = f1p_ref[...]  # (TB, C) bf16

        def head2(w_top, w_bot, b1, w2, b2):
            # Linear(2C -> C) with the concat folded into two half-matmuls,
            # then ReLU, then Linear(C -> C). f32 accumulation throughout.
            h = (jnp.dot(fb, w_top[...], preferred_element_type=f32)
                 + jnp.dot(f1b, w_bot[...], preferred_element_type=f32)
                 + b1[...])
            h = jnp.maximum(h, 0.0).astype(bf16)
            return jnp.dot(h, w2[...], preferred_element_type=f32) + b2[...]

        feats_pad = head2(wp1t_ref, wp1b_ref, bp1_ref, wp2_ref, bp2_ref)  # (TB, C) f32
        feats_id = head2(wi1t_ref, wi1b_ref, bi1_ref, wi2_ref, bi2_ref)   # (TB, C) f32

        # head_classification first layer: Linear(C -> C) + ReLU, kept resident
        # in scratch across the class-column grid axis.
        hc = (jnp.dot(feats_pad.astype(bf16), wc1_ref[...],
                      preferred_element_type=f32) + bc1_ref[...])
        hc_ref[...] = jnp.maximum(hc, 0.0).astype(bf16)

        # L2 norm per row via a single EUP rsqrt: norm = sumsq * rsqrt(sumsq).
        # Note: matches PyTorch (no eps) -- degenerate all-zero rows misbehave
        # there too.
        sumsq = jnp.sum(feats_id * feats_id, axis=1, keepdims=True)  # (TB, 1)
        inv_norm = jax.lax.rsqrt(sumsq)

        fpad_ref[...] = feats_pad
        fid_ref[...] = feats_id
        fidn_ref[...] = feats_id * inv_norm
        norm_ref[...] = sumsq * inv_norm

    # Classification second layer: one lane-dense (C, TNC) column block of wc2
    # per grid step (pipelined across j).
    pred_ref[...] = (jnp.dot(hc_ref[...], wc2_ref[...], preferred_element_type=f32)
                     + bc2_ref[...]).astype(pred_ref.dtype)


def _pick_tile_b(B, tile_b):
    """Largest sublane-aligned divisor of B <= tile_b; >=2 grid steps when B >= 16
    so v7x's 2 TensorCores both get work (no-op on v5e/v6e)."""
    cap = min(tile_b, B)
    if B >= 16:
        cap = min(cap, B // 2)
    for tb in range(cap, 0, -1):
        if B % tb == 0 and (tb % 8 == 0 or tb == B):
            return tb
    return B


def _pick_tile_nc(num_classes, max_tile):
    """Lane-dense column tile for wc2 / pred (multiple of 128 unless it covers
    the whole class dim)."""
    if num_classes <= max_tile:
        return num_classes
    start = (max_tile // 128) * 128
    for t in range(start, 127, -128):
        if num_classes % t == 0:
            return t
    return num_classes


def _vmem_limit_bytes():
    """Per-generation scoped VMEM cap: leave headroom under v7x's 64 MiB/TC,
    go wide on v5e/v6e's 128 MiB."""
    try:
        cap = int(pltpu.get_tpu_info().vmem_capacity_bytes)
    except Exception:
        return None
    if cap <= 64 * 1024 * 1024:
        return max(16 * 1024 * 1024, min(cap - 8 * 1024 * 1024, 48 * 1024 * 1024))
    return min(cap, 100 * 1024 * 1024)


def orthid_forward(f, f_aug, params, *, tile_b=256, tile_nc=2048,
                   pred_dtype=jnp.float32, weight_buffering=None):
    """f, f_aug: (B, C, H, W) float32 backbone feature maps.

    AdaptiveAvgPool2d runs in XLA on the native NCHW layout (a cheap fused f32
    reduction), so the kernel only streams the pooled (B, C) bf16 tensors --
    no transpose round trip, no HW-times-larger feature-map DMA.

    tile_b: batch tile upper bound. 256 fills the 256x256 MXU M-dim on v6e/v7x;
            pass 128 on v5e (4x 128x128 MXUs).
    """
    B, C = f.shape[0], f.shape[1]
    num_classes = params["wc2"].shape[1]
    bf16 = jnp.bfloat16

    # AdaptiveAvgPool2d(1).squeeze() in f32; cast to bf16 only for the MXU matmuls.
    f_pool = jnp.mean(f, axis=(2, 3)).astype(bf16)        # (B, C)
    f1_pool = jnp.mean(f_aug, axis=(2, 3)).astype(bf16)   # (B, C)

    TB = _pick_tile_b(B, tile_b)
    TNC = _pick_tile_nc(num_classes, tile_nc)
    grid = (B // TB, num_classes // TNC)

    # Split the first Linear of head_pad / head_id into concat-free halves.
    wp1t = params["wp1"][:C].astype(bf16)
    wp1b = params["wp1"][C:].astype(bf16)
    wi1t = params["wi1"][:C].astype(bf16)
    wi1b = params["wi1"][C:].astype(bf16)

    resident_weights = (
        wp1t, wp1b, params["bp1"], params["wp2"].astype(bf16), params["bp2"],
        wi1t, wi1b, params["bi1"], params["wi2"].astype(bf16), params["bi2"],
        params["wc1"].astype(bf16), params["bc1"],
    )
    wc2 = params["wc2"].astype(bf16)
    bc2 = params["bc2"]
    args = (f_pool, f1_pool) + resident_weights + (wc2, bc2)

    def const_spec(a):
        # Grid-invariant (resident) weight/bias block. With weight_buffering=1
        # these are single-buffered (pl.Buffered) to reclaim VMEM on v7x; off by
        # default for compatibility with jax versions lacking pipeline_mode.
        idx = lambda i, j, n=a.ndim: (0,) * n
        if weight_buffering is not None:
            return pl.BlockSpec(a.shape, idx,
                                pipeline_mode=pl.Buffered(int(weight_buffering)))
        return pl.BlockSpec(a.shape, idx)

    in_specs = (
        [pl.BlockSpec((TB, C), lambda i, j: (i, 0)),
         pl.BlockSpec((TB, C), lambda i, j: (i, 0))]
        + [const_spec(a) for a in resident_weights]
        + [pl.BlockSpec((C, TNC), lambda i, j: (0, j)),   # wc2 column block
           pl.BlockSpec((1, TNC), lambda i, j: (0, j))]   # bc2 column block
    )

    out_shape = (
        jax.ShapeDtypeStruct((B, num_classes), pred_dtype),  # pred
        jax.ShapeDtypeStruct((B, C), jnp.float32),           # feats_pad
        jax.ShapeDtypeStruct((B, C), jnp.float32),           # feats_id
        jax.ShapeDtypeStruct((B, C), jnp.float32),           # feats_id_norm (AdaFace input)
        jax.ShapeDtypeStruct((B, 1), jnp.float32),           # norm (AdaFace input)
    )
    out_specs = (
        pl.BlockSpec((TB, TNC), lambda i, j: (i, j)),
        pl.BlockSpec((TB, C), lambda i, j: (i, 0)),
        pl.BlockSpec((TB, C), lambda i, j: (i, 0)),
        pl.BlockSpec((TB, C), lambda i, j: (i, 0)),
        pl.BlockSpec((TB, 1), lambda i, j: (i, 0)),
    )

    compiler_kwargs = dict(dimension_semantics=("parallel", "arbitrary"))
    vlim = _vmem_limit_bytes()
    if vlim is not None:
        compiler_kwargs["vmem_limit_bytes"] = int(vlim)

    return pl.pallas_call(
        orthid_head_kernel,
        grid=grid,
        in_specs=in_specs,
        out_specs=out_specs,
        out_shape=out_shape,
        scratch_shapes=[pltpu.VMEM((TB, C), bf16)],  # resident classification hidden
        compiler_params=pltpu.CompilerParams(**compiler_kwargs),
    )(*args)


def orthid_reference(f, f_aug, params):
    """Pure-JAX f32 reference mirroring the PyTorch forward (train path, up to AdaFace)."""
    f_feat = jnp.mean(f, axis=(2, 3))
    f1_feat = jnp.mean(f_aug, axis=(2, 3))
    feats = jnp.concatenate([f_feat, f1_feat], axis=1)

    def mlp2(x, w1, b1, w2, b2):
        h = jnp.maximum(x @ w1 + b1, 0.0)
        return h @ w2 + b2

    feats_pad = mlp2(feats, params["wp1"], params["bp1"], params["wp2"], params["bp2"])
    feats_id = mlp2(feats, params["wi1"], params["bi1"], params["wi2"], params["bi2"])
    pred = mlp2(feats_pad, params["wc1"], params["bc1"], params["wc2"], params["bc2"])
    norm = jnp.linalg.norm(feats_id, axis=1, keepdims=True)
    return pred, feats_pad, feats_id, feats_id / norm, norm


def init_params(key, in_channels, num_classes):
    C = in_channels
    ks = jax.random.split(key, 6)
    scale = 0.05

    def lin(k, fan_in, fan_out):
        return scale * jax.random.normal(k, (fan_in, fan_out), jnp.float32)

    return {
        # head_pad: Linear(2C -> C), ReLU, Linear(C -> C)
        "wp1": lin(ks[0], 2 * C, C), "bp1": jnp.full((1, C), 0.01, jnp.float32),
        "wp2": lin(ks[1], C, C), "bp2": jnp.full((1, C), -0.01, jnp.float32),
        # head_id: Linear(2C -> C), ReLU, Linear(C -> C)
        "wi1": lin(ks[2], 2 * C, C), "bi1": jnp.full((1, C), 0.02, jnp.float32),
        "wi2": lin(ks[3], C, C), "bi2": jnp.full((1, C), -0.02, jnp.float32),
        # head_classification: Linear(C -> C), ReLU, Linear(C -> num_classes)
        "wc1": lin(ks[4], C, C), "bc1": jnp.zeros((1, C), jnp.float32),
        "wc2": lin(ks[5], C, num_classes), "bc2": jnp.zeros((1, num_classes), jnp.float32),
    }


if __name__ == "__main__":
    key = jax.random.PRNGKey(0)
    k_f, k_fa, k_p = jax.random.split(key, 3)

    # Small stand-in for resnet18's (B, 512, 7, 7) backbone features.
    B, C, H, W = 16, 32, 4, 4
    num_classes = 8

    f = jax.random.normal(k_f, (B, C, H, W), jnp.float32)
    f_aug = jax.random.normal(k_fa, (B, C, H, W), jnp.float32)
    params = init_params(k_p, C, num_classes)

    # B=16 -> batch tile 8 -> grid=(2, 1): exercises the batch-tiled,
    # megacore-friendly pipelined path plus the class-column axis.
    outs = orthid_forward(f, f_aug, params)
    outs = jax.block_until_ready(outs)

    refs = orthid_reference(f, f_aug, params)
    names = ("pred", "feats_pad", "feats_id", "feats_id_norm", "norm")
    for name, o, r in zip(names, outs, refs):
        assert o.shape == r.shape, (name, o.shape, r.shape)
        # bf16 operands (f32 accumulation) vs f32 reference -> loosened tolerance.
        assert jnp.allclose(o, r, atol=2e-2, rtol=5e-2), (
            name, float(jnp.max(jnp.abs(o - r))))

    print("KERNEL_OK")
</pallas_src>

<mosaic_0001>
module attributes {stable_mosaic.version = 11 : i64} {
  func.func @orthid_head_kernel(%arg0: i32, %arg1: i32, %arg2: memref<8x32xbf16, #tpu.memory_space<vmem>>, %arg3: memref<8x32xbf16, #tpu.memory_space<vmem>>, %arg4: memref<32x32xbf16, #tpu.memory_space<vmem>>, %arg5: memref<32x32xbf16, #tpu.memory_space<vmem>>, %arg6: memref<1x32xf32, #tpu.memory_space<vmem>>, %arg7: memref<32x32xbf16, #tpu.memory_space<vmem>>, %arg8: memref<1x32xf32, #tpu.memory_space<vmem>>, %arg9: memref<32x32xbf16, #tpu.memory_space<vmem>>, %arg10: memref<32x32xbf16, #tpu.memory_space<vmem>>, %arg11: memref<1x32xf32, #tpu.memory_space<vmem>>, %arg12: memref<32x32xbf16, #tpu.memory_space<vmem>>, %arg13: memref<1x32xf32, #tpu.memory_space<vmem>>, %arg14: memref<32x32xbf16, #tpu.memory_space<vmem>>, %arg15: memref<1x32xf32, #tpu.memory_space<vmem>>, %arg16: memref<32x8xbf16, #tpu.memory_space<vmem>>, %arg17: memref<1x8xf32, #tpu.memory_space<vmem>>, %arg18: memref<8x8xf32, #tpu.memory_space<vmem>>, %arg19: memref<8x32xf32, #tpu.memory_space<vmem>>, %arg20: memref<8x32xf32, #tpu.memory_space<vmem>>, %arg21: memref<8x32xf32, #tpu.memory_space<vmem>>, %arg22: memref<8x1xf32, #tpu.memory_space<vmem>>, %arg23: memref<8x32xbf16, #tpu.memory_space<vmem>>) attributes {dimension_semantics = [#tpu.dimension_semantics<parallel>, #tpu.dimension_semantics<arbitrary>], iteration_bounds = array<i64: 2, 1>, scalar_prefetch = 0 : i64, scratch_operands = 1 : i64, tpu.core_type = #tpu.core_type<tc>, window_params = [{transform_indices = @transform_0, window_bounds = array<i64: 8, 32>}, {transform_indices = @transform_1, window_bounds = array<i64: 8, 32>}, {pipeline_mode = #tpu.pipeline_mode<synchronous>, transform_indices = @transform_2, window_bounds = array<i64: 32, 32>}, {pipeline_mode = #tpu.pipeline_mode<synchronous>, transform_indices = @transform_3, window_bounds = array<i64: 32, 32>}, {pipeline_mode = #tpu.pipeline_mode<synchronous>, transform_indices = @transform_4, window_bounds = array<i64: 1, 32>}, {pipeline_mode = #tpu.pipeline_mode<synchronous>, transform_indices = @transform_5, window_bounds = array<i64: 32, 32>}, {pipeline_mode = #tpu.pipeline_mode<synchronous>, transform_indices = @transform_6, window_bounds = array<i64: 1, 32>}, {pipeline_mode = #tpu.pipeline_mode<synchronous>, transform_indices = @transform_7, window_bounds = array<i64: 32, 32>}, {pipeline_mode = #tpu.pipeline_mode<synchronous>, transform_indices = @transform_8, window_bounds = array<i64: 32, 32>}, {pipeline_mode = #tpu.pipeline_mode<synchronous>, transform_indices = @transform_9, window_bounds = array<i64: 1, 32>}, {pipeline_mode = #tpu.pipeline_mode<synchronous>, transform_indices = @transform_10, window_bounds = array<i64: 32, 32>}, {pipeline_mode = #tpu.pipeline_mode<synchronous>, transform_indices = @transform_11, window_bounds = array<i64: 1, 32>}, {pipeline_mode = #tpu.pipeline_mode<synchronous>, transform_indices = @transform_12, window_bounds = array<i64: 32, 32>}, {pipeline_mode = #tpu.pipeline_mode<synchronous>, transform_indices = @transform_13, window_bounds = array<i64: 1, 32>}, {transform_indices = @transform_14, window_bounds = array<i64: 32, 8>}, {transform_indices = @transform_15, window_bounds = array<i64: 1, 8>}, {transform_indices = @transform_16, window_bounds = array<i64: 8, 8>}, {transform_indices = @transform_17, window_bounds = array<i64: 8, 32>}, {transform_indices = @transform_18, window_bounds = array<i64: 8, 32>}, {transform_indices = @transform_19, window_bounds = array<i64: 8, 32>}, {transform_indices = @transform_20, window_bounds = array<i64: 8, 1>}]} {
    %c0_i32 = arith.constant 0 : i32
    %0 = arith.cmpi eq, %arg1, %c0_i32 : i32
    %1 = arith.extui %0 : i1 to i32
    %c0_i32_0 = arith.constant 0 : i32
    %2 = arith.cmpi ne, %1, %c0_i32_0 : i32
    scf.if %2 {
      %c0_8 = arith.constant 0 : index
      %c0_9 = arith.constant 0 : index
      %10 = vector.load %arg2[%c0_8, %c0_9] : memref<8x32xbf16, #tpu.memory_space<vmem>>, vector<8x32xbf16>
      %c0_10 = arith.constant 0 : index
      %c0_11 = arith.constant 0 : index
      %11 = vector.load %arg3[%c0_10, %c0_11] : memref<8x32xbf16, #tpu.memory_space<vmem>>, vector<8x32xbf16>
      %c0_12 = arith.constant 0 : index
      %c0_13 = arith.constant 0 : index
      %12 = vector.load %arg4[%c0_12, %c0_13] : memref<32x32xbf16, #tpu.memory_space<vmem>>, vector<32x32xbf16>
      %cst_14 = arith.constant dense<0.000000e+00> : vector<8x32xf32>
      %13 = tpu.matmul %10, %12, %cst_14 {dimension_numbers = #tpu.dot_dimension_numbers<[1], [0], [0], [1], [0, 0, 1, 1], [], []>} : vector<8x32xbf16>, vector<32x32xbf16>, vector<8x32xf32> -> vector<8x32xf32>
      %c0_15 = arith.constant 0 : index
      %c0_16 = arith.constant 0 : index
      %14 = vector.load %arg5[%c0_15, %c0_16] : memref<32x32xbf16, #tpu.memory_space<vmem>>, vector<32x32xbf16>
      %cst_17 = arith.constant dense<0.000000e+00> : vector<8x32xf32>
      %15 = tpu.matmul %11, %14, %cst_17 {dimension_numbers = #tpu.dot_dimension_numbers<[1], [0], [0], [1], [0, 0, 1, 1], [], []>} : vector<8x32xbf16>, vector<32x32xbf16>, vector<8x32xf32> -> vector<8x32xf32>
      %16 = arith.addf %13, %15 : vector<8x32xf32>
      %c0_18 = arith.constant 0 : index
      %c0_19 = arith.constant 0 : index
      %17 = vector.load %arg6[%c0_18, %c0_19] : memref<1x32xf32, #tpu.memory_space<vmem>>, vector<1x32xf32>
      %18 = vector.broadcast %17 : vector<1x32xf32> to vector<8x32xf32>
      %19 = arith.addf %16, %18 : vector<8x32xf32>
      %cst_20 = arith.constant 0.000000e+00 : f32
      %20 = vector.broadcast %cst_20 : f32 to vector<8x32xf32>
      %21 = arith.maximumf %19, %20 : vector<8x32xf32>
      %22 = arith.truncf %21 : vector<8x32xf32> to vector<8x32xbf16>
      %c0_21 = arith.constant 0 : index
      %c0_22 = arith.constant 0 : index
      %23 = vector.load %arg7[%c0_21, %c0_22] : memref<32x32xbf16, #tpu.memory_space<vmem>>, vector<32x32xbf16>
      %cst_23 = arith.constant dense<0.000000e+00> : vector<8x32xf32>
      %24 = tpu.matmul %22, %23, %cst_23 {dimension_numbers = #tpu.dot_dimension_numbers<[1], [0], [0], [1], [0, 0, 1, 1], [], []>} : vector<8x32xbf16>, vector<32x32xbf16>, vector<8x32xf32> -> vector<8x32xf32>
      %c0_24 = arith.constant 0 : index
      %c0_25 = arith.constant 0 : index
      %25 = vector.load %arg8[%c0_24, %c0_25] : memref<1x32xf32, #tpu.memory_space<vmem>>, vector<1x32xf32>
      %26 = vector.broadcast %25 : vector<1x32xf32> to vector<8x32xf32>
      %27 = arith.addf %24, %26 : vector<8x32xf32>
      %c0_26 = arith.constant 0 : index
      %c0_27 = arith.constant 0 : index
      %28 = vector.load %arg9[%c0_26, %c0_27] : memref<32x32xbf16, #tpu.memory_space<vmem>>, vector<32x32xbf16>
      %cst_28 = arith.constant dense<0.000000e+00> : vector<8x32xf32>
      %29 = tpu.matmul %10, %28, %cst_28 {dimension_numbers = #tpu.dot_dimension_numbers<[1], [0], [0], [1], [0, 0, 1, 1], [], []>} : vector<8x32xbf16>, vector<32x32xbf16>, vector<8x32xf32> -> vector<8x32xf32>
      %c0_29 = arith.constant 0 : index
      %c0_30 = arith.constant 0 : index
      %30 = vector.load %arg10[%c0_29, %c0_30] : memref<32x32xbf16, #tpu.memory_space<vmem>>, vector<32x32xbf16>
      %cst_31 = arith.constant dense<0.000000e+00> : vector<8x32xf32>
      %31 = tpu.matmul %11, %30, %cst_31 {dimension_numbers = #tpu.dot_dimension_numbers<[1], [0], [0], [1], [0, 0, 1, 1], [], []>} : vector<8x32xbf16>, vector<32x32xbf16>, vector<8x32xf32> -> vector<8x32xf32>
      %32 = arith.addf %29, %31 : vector<8x32xf32>
      %c0_32 = arith.constant 0 : index
      %c0_33 = arith.constant 0 : index
      %33 = vector.load %arg11[%c0_32, %c0_33] : memref<1x32xf32, #tpu.memory_space<vmem>>, vector<1x32xf32>
      %34 = vector.broadcast %33 : vector<1x32xf32> to vector<8x32xf32>
      %35 = arith.addf %32, %34 : vector<8x32xf32>
      %cst_34 = arith.constant 0.000000e+00 : f32
      %36 = vector.broadcast %cst_34 : f32 to vector<8x32xf32>
      %37 = arith.maximumf %35, %36 : vector<8x32xf32>
      %38 = arith.truncf %37 : vector<8x32xf32> to vector<8x32xbf16>
      %c0_35 = arith.constant 0 : index
      %c0_36 = arith.constant 0 : index
      %39 = vector.load %arg12[%c0_35, %c0_36] : memref<32x32xbf16, #tpu.memory_space<vmem>>, vector<32x32xbf16>
      %cst_37 = arith.constant dense<0.000000e+00> : vector<8x32xf32>
      %40 = tpu.matmul %38, %39, %cst_37 {dimension_numbers = #tpu.dot_dimension_numbers<[1], [0], [0], [1], [0, 0, 1, 1], [], []>} : vector<8x32xbf16>, vector<32x32xbf16>, vector<8x32xf32> -> vector<8x32xf32>
      %c0_38 = arith.constant 0 : index
      %c0_39 = arith.constant 0 : index
      %41 = vector.load %arg13[%c0_38, %c0_39] : memref<1x32xf32, #tpu.memory_space<vmem>>, vector<1x32xf32>
      %42 = vector.broadcast %41 : vector<1x32xf32> to vector<8x32xf32>
      %43 = arith.addf %40, %42 : vector<8x32xf32>
      %44 = arith.truncf %27 : vector<8x32xf32> to vector<8x32xbf16>
      %c0_40 = arith.constant 0 : index
      %c0_41 = arith.constant 0 : index
      %45 = vector.load %arg14[%c0_40, %c0_41] : memref<32x32xbf16, #tpu.memory_space<vmem>>, vector<32x32xbf16>
      %cst_42 = arith.constant dense<0.000000e+00> : vector<8x32xf32>
      %46 = tpu.matmul %44, %45, %cst_42 {dimension_numbers = #tpu.dot_dimension_numbers<[1], [0], [0], [1], [0, 0, 1, 1], [], []>} : vector<8x32xbf16>, vector<32x32xbf16>, vector<8x32xf32> -> vector<8x32xf32>
      %c0_43 = arith.constant 0 : index
      %c0_44 = arith.constant 0 : index
      %47 = vector.load %arg15[%c0_43, %c0_44] : memref<1x32xf32, #tpu.memory_space<vmem>>, vector<1x32xf32>
      %48 = vector.broadcast %47 : vector<1x32xf32> to vector<8x32xf32>
      %49 = arith.addf %46, %48 : vector<8x32xf32>
      %cst_45 = arith.constant 0.000000e+00 : f32
      %50 = vector.broadcast %cst_45 : f32 to vector<8x32xf32>
      %51 = arith.maximumf %49, %50 : vector<8x32xf32>
      %52 = arith.truncf %51 : vector<8x32xf32> to vector<8x32xbf16>
      %c0_46 = arith.constant 0 : index
      %c0_47 = arith.constant 0 : index
      %53 = vector.load %arg23[%c0_46, %c0_47] : memref<8x32xbf16, #tpu.memory_space<vmem>>, vector<8x32xbf16>
      tpu.vector_store %arg23[%c0_46, %c0_47], %52 {strides = array<i32>} : memref<8x32xbf16, #tpu.memory_space<vmem>>, vector<8x32xbf16>,
      %54 = arith.mulf %43, %43 : vector<8x32xf32>
      %cst_48 = arith.constant dense<0.000000e+00> : vector<8xf32>
      %55 = vector.multi_reduction <add>, %54, %cst_48 [1] : vector<8x32xf32> to vector<8xf32>
      %56 = vector.shape_cast %55 : vector<8xf32> to vector<8x1xf32>
      %57 = math.rsqrt %56 : vector<8x1xf32>
      %c0_49 = arith.constant 0 : index
      %c0_50 = arith.constant 0 : index
      %58 = vector.load %arg19[%c0_49, %c0_50] : memref<8x32xf32, #tpu.memory_space<vmem>>, vector<8x32xf32>
      tpu.vector_store %arg19[%c0_49, %c0_50], %27 {strides = array<i32>} : memref<8x32xf32, #tpu.memory_space<vmem>>, vector<8x32xf32>,
      %c0_51 = arith.constant 0 : index
      %c0_52 = arith.constant 0 : index
      %59 = vector.load %arg20[%c0_51, %c0_52] : memref<8x32xf32, #tpu.memory_space<vmem>>, vector<8x32xf32>
      tpu.vector_store %arg20[%c0_51, %c0_52], %43 {strides = array<i32>} : memref<8x32xf32, #tpu.memory_space<vmem>>, vector<8x32xf32>,
      %60 = vector.broadcast %57 : vector<8x1xf32> to vector<8x32xf32>
      %61 = arith.mulf %43, %60 : vector<8x32xf32>
      %c0_53 = arith.constant 0 : index
      %c0_54 = arith.constant 0 : index
      %62 = vector.load %arg21[%c0_53, %c0_54] : memref<8x32xf32, #tpu.memory_space<vmem>>, vector<8x32xf32>
      tpu.vector_store %arg21[%c0_53, %c0_54], %61 {strides = array<i32>} : memref<8x32xf32, #tpu.memory_space<vmem>>, vector<8x32xf32>,
      %63 = arith.mulf %56, %57 : vector<8x1xf32>
      %c0_55 = arith.constant 0 : index
      %c0_56 = arith.constant 0 : index
      %64 = vector.load %arg22[%c0_55, %c0_56] : memref<8x1xf32, #tpu.memory_space<vmem>>, vector<8x1xf32>
      tpu.vector_store %arg22[%c0_55, %c0_56], %63 {strides = array<i32>} : memref<8x1xf32, #tpu.memory_space<vmem>>, vector<8x1xf32>,
    } else {
    }
    %c0 = arith.constant 0 : index
    %c0_1 = arith.constant 0 : index
    %3 = vector.load %arg23[%c0, %c0_1] : memref<8x32xbf16, #tpu.memory_space<vmem>>, vector<8x32xbf16>
    %c0_2 = arith.constant 0 : index
    %c0_3 = arith.constant 0 : index
    %4 = vector.load %arg16[%c0_2, %c0_3] : memref<32x8xbf16, #tpu.memory_space<vmem>>, vector<32x8xbf16>
    %cst = arith.constant dense<0.000000e+00> : vector<8x8xf32>
    %5 = tpu.matmul %3, %4, %cst {dimension_numbers = #tpu.dot_dimension_numbers<[1], [0], [0], [1], [0, 0, 1, 1], [], []>} : vector<8x32xbf16>, vector<32x8xbf16>, vector<8x8xf32> -> vector<8x8xf32>
    %c0_4 = arith.constant 0 : index
    %c0_5 = arith.constant 0 : index
    %6 = vector.load %arg17[%c0_4, %c0_5] : memref<1x8xf32, #tpu.memory_space<vmem>>, vector<1x8xf32>
    %7 = vector.broadcast %6 : vector<1x8xf32> to vector<8x8xf32>
    %8 = arith.addf %5, %7 : vector<8x8xf32>
    %c0_6 = arith.constant 0 : index
    %c0_7 = arith.constant 0 : index
    %9 = vector.load %arg18[%c0_6, %c0_7] : memref<8x8xf32, #tpu.memory_space<vmem>>, vector<8x8xf32>
    tpu.vector_store %arg18[%c0_6, %c0_7], %8 {strides = array<i32>} : memref<8x8xf32, #tpu.memory_space<vmem>>, vector<8x8xf32>,
    return
  }
  func.func @transform_0(%arg0: i32, %arg1: i32) -> (i32, i32) {
    %c0_i32 = arith.constant 0 : i32
    %c0_i32_0 = arith.constant 0 : i32
    return %arg0, %c0_i32 : i32, i32
  }
  func.func @transform_1(%arg0: i32, %arg1: i32) -> (i32, i32) {
    %c0_i32 = arith.constant 0 : i32
    %c0_i32_0 = arith.constant 0 : i32
    return %arg0, %c0_i32 : i32, i32
  }
  func.func @transform_2(%arg0: i32, %arg1: i32) -> (i32, i32) {
    %c0_i32 = arith.constant 0 : i32
    %c0_i32_0 = arith.constant 0 : i32
    %c0_i32_1 = arith.constant 0 : i32
    return %c0_i32, %c0_i32_0 : i32, i32
  }
  func.func @transform_3(%arg0: i32, %arg1: i32) -> (i32, i32) {
    %c0_i32 = arith.constant 0 : i32
    %c0_i32_0 = arith.constant 0 : i32
    %c0_i32_1 = arith.constant 0 : i32
    return %c0_i32, %c0_i32_0 : i32, i32
  }
  func.func @transform_4(%arg0: i32, %arg1: i32) -> (i32, i32) {
    %c0_i32 = arith.constant 0 : i32
    %c0_i32_0 = arith.constant 0 : i32
    %c0_i32_1 = arith.constant 0 : i32
    return %c0_i32, %c0_i32_0 : i32, i32
  }
  func.func @transform_5(%arg0: i32, %arg1: i32) -> (i32, i32) {
    %c0_i32 = arith.constant 0 : i32
    %c0_i32_0 = arith.constant 0 : i32
    %c0_i32_1 = arith.constant 0 : i32
    return %c0_i32, %c0_i32_0 : i32, i32
  }
  func.func @transform_6(%arg0: i32, %arg1: i32) -> (i32, i32) {
    %c0_i32 = arith.constant 0 : i32
    %c0_i32_0 = arith.constant 0 : i32
    %c0_i32_1 = arith.constant 0 : i32
    return %c0_i32, %c0_i32_0 : i32, i32
  }
  func.func @transform_7(%arg0: i32, %arg1: i32) -> (i32, i32) {
    %c0_i32 = arith.constant 0 : i32
    %c0_i32_0 = arith.constant 0 : i32
    %c0_i32_1 = arith.constant 0 : i32
    return %c0_i32, %c0_i32_0 : i32, i32
  }
  func.func @transform_8(%arg0: i32, %arg1: i32) -> (i32, i32) {
    %c0_i32 = arith.constant 0 : i32
    %c0_i32_0 = arith.constant 0 : i32
    %c0_i32_1 = arith.constant 0 : i32
    return %c0_i32, %c0_i32_0 : i32, i32
  }
  func.func @transform_9(%arg0: i32, %arg1: i32) -> (i32, i32) {
    %c0_i32 = arith.constant 0 : i32
    %c0_i32_0 = arith.constant 0 : i32
    %c0_i32_1 = arith.constant 0 : i32
    return %c0_i32, %c0_i32_0 : i32, i32
  }
  func.func @transform_10(%arg0: i32, %arg1: i32) -> (i32, i32) {
    %c0_i32 = arith.constant 0 : i32
    %c0_i32_0 = arith.constant 0 : i32
    %c0_i32_1 = arith.constant 0 : i32
    return %c0_i32, %c0_i32_0 : i32, i32
  }
  func.func @transform_11(%arg0: i32, %arg1: i32) -> (i32, i32) {
    %c0_i32 = arith.constant 0 : i32
    %c0_i32_0 = arith.constant 0 : i32
    %c0_i32_1 = arith.constant 0 : i32
    return %c0_i32, %c0_i32_0 : i32, i32
  }
  func.func @transform_12(%arg0: i32, %arg1: i32) -> (i32, i32) {
    %c0_i32 = arith.constant 0 : i32
    %c0_i32_0 = arith.constant 0 : i32
    %c0_i32_1 = arith.constant 0 : i32
    return %c0_i32, %c0_i32_0 : i32, i32
  }
  func.func @transform_13(%arg0: i32, %arg1: i32) -> (i32, i32) {
    %c0_i32 = arith.constant 0 : i32
    %c0_i32_0 = arith.constant 0 : i32
    %c0_i32_1 = arith.constant 0 : i32
    return %c0_i32, %c0_i32_0 : i32, i32
  }
  func.func @transform_14(%arg0: i32, %arg1: i32) -> (i32, i32) {
    %c0_i32 = arith.constant 0 : i32
    %c0_i32_0 = arith.constant 0 : i32
    return %c0_i32, %arg1 : i32, i32
  }
  func.func @transform_15(%arg0: i32, %arg1: i32) -> (i32, i32) {
    %c0_i32 = arith.constant 0 : i32
    %c0_i32_0 = arith.constant 0 : i32
    return %c0_i32, %arg1 : i32, i32
  }
  func.func @transform_16(%arg0: i32, %arg1: i32) -> (i32, i32) {
    %c0_i32 = arith.constant 0 : i32
    return %arg0, %arg1 : i32, i32
  }
  func.func @transform_17(%arg0: i32, %arg1: i32) -> (i32, i32) {
    %c0_i32 = arith.constant 0 : i32
    %c0_i32_0 = arith.constant 0 : i32
    return %arg0, %c0_i32 : i32, i32
  }
  func.func @transform_18(%arg0: i32, %arg1: i32) -> (i32, i32) {
    %c0_i32 = arith.constant 0 : i32
    %c0_i32_0 = arith.constant 0 : i32
    return %arg0, %c0_i32 : i32, i32
  }
  func.func @transform_19(%arg0: i32, %arg1: i32) -> (i32, i32) {
    %c0_i32 = arith.constant 0 : i32
    %c0_i32_0 = arith.constant 0 : i32
    return %arg0, %c0_i32 : i32, i32
  }
  func.func @transform_20(%arg0: i32, %arg1: i32) -> (i32, i32) {
    %c0_i32 = arith.constant 0 : i32
    %c0_i32_0 = arith.constant 0 : i32
    return %arg0, %c0_i32 : i32, i32
  }
}

</mosaic_0001>

<bundles_post_ra>
// kernel: tpu_custom_call.1
= control target key start
LH: loop header
LB: loop body
LE: loop exit
PB: predicated region body
PF: predicated region fallthrough
CT: control target
= control target key end

     0   :  { %s2688_s0 = inlined_call_operand.hbm [shape: bf16[16,32], index: 0, kind: input, shape index: {}]   ;;  %s2689_s1 = inlined_call_operand.hbm [shape: bf16[16,32], index: 1, kind: input, shape index: {}]   ;;  %s2690_s2 = inlined_call_operand.vmem [shape: bf16[32,32], index: 2, kind: input, shape index: {}]   ;;  %s2691_s3 = inlined_call_operand.hbm [shape: bf16[32,32], index: 3, kind: input, shape index: {}]   ;;  %s2692_s4 = inlined_call_operand.vmem [shape: f32[1,32], index: 4, kind: input, shape index: {}]   ;;  %s2693_s5 = inlined_call_operand.hbm [shape: bf16[32,32], index: 5, kind: input, shape index: {}]   ;;  %s2694_s6 = inlined_call_operand.vmem [shape: f32[1,32], index: 6, kind: input, shape index: {}]   ;;  %s2695_s7 = inlined_call_operand.hbm [shape: bf16[32,32], index: 7, kind: input, shape index: {}]   ;;  %s2696_s8 = inlined_call_operand.hbm [shape: bf16[32,32], index: 8, kind: input, shape index: {}]   ;;  %s2697_s9 = inlined_call_operand.vmem [shape: f32[1,32], index: 9, kind: input, shape index: {}]   ;;  %s2698_s10 = inlined_call_operand.hbm [shape: bf16[32,32], index: 10, kind: input, shape index: {}]   ;;  %s2699_s11 = inlined_call_operand.vmem [shape: f32[1,32], index: 11, kind: input, shape index: {}]   ;;  %s2700_s12 = inlined_call_operand.hbm [shape: bf16[32,32], index: 12, kind: input, shape index: {}]   ;;  %s2701_s13 = inlined_call_operand.vmem [shape: f32[1,32], index: 13, kind: input, shape index: {}]   ;;  %s2702_s14 = inlined_call_operand.vmem [shape: bf16[32,8], index: 14, kind: input, shape index: {}]   ;;  %s2703_s15 = inlined_call_operand.vmem [shape: f32[1,8], index: 15, kind: input, shape index: {}]   ;;  %s2704_s16 = inlined_call_operand.vmem [shape: f32[16,8], index: 16, kind: output, shape index: {0}]   ;;  %s2705_s17 = inlined_call_operand.hbm [shape: f32[16,32], index: 17, kind: output, shape index: {1}]   ;;  %s2706_s18 = inlined_call_operand.hbm [shape: f32[16,32], index: 18, kind: output, shape index: {2}]   ;;  %s2707_s19 = inlined_call_operand.hbm [shape: f32[16,32], index: 19, kind: output, shape index: {3}]   ;;  %s2708_s20 = inlined_call_operand.vmem [shape: f32[16,1], index: 20, kind: output, shape index: {4}]  }
   0x1   :  { %2720 = sst [smem:[#allocation35_spill]] %s2688_s0 }
   0x2   :  { %2721 = sst [smem:[#allocation36_spill]] %s2689_s1 }
   0x3   :  { %2722 = sst [smem:[#allocation37_spill]] %s2690_s2 }
   0x4   :  { %2723 = sst [smem:[#allocation38_spill]] %s2691_s3 }
   0x5   :  { %2724 = sst [smem:[#allocation39_spill]] %s2692_s4 }
   0x6   :  { %2725 = sst [smem:[#allocation40_spill]] %s2693_s5 }
   0x7   :  { %2726 = sst [smem:[#allocation41_spill]] %s2695_s7 }
   0x8   :  { %2727 = sst [smem:[#allocation42_spill]] %s2696_s8 }
   0x9   :  { %2728 = sst [smem:[#allocation43_spill]] %s2698_s10 }
   0xa   :  { %2729 = sst [smem:[#allocation44_spill]] %s2700_s12 }
   0xb   :  { %2730 = sst [smem:[#allocation45_spill]] %s2701_s13 }
   0xc   :  { %2731 = sst [smem:[#allocation46_spill]] %s2703_s15 }
   0xd   :  { %2732 = sst [smem:[#allocation47_spill]] %s2704_s16 }
   0xe   :  { %2733 = sst [smem:[#allocation48_spill]] %s2705_s17 }
   0xf   :  { %2734 = sst [smem:[#allocation49_spill]] %s2706_s18 }
  0x10   :  { %2735 = sst [smem:[#allocation50_spill]] %s2707_s19 }
  0x11   :  { %2736 = sst [smem:[#allocation51_spill]] %s2708_s20 }
  0x12   :  { %26 = vsyncpa [#allocation4], 0 }
  0x13   :  { %28 = vsyncpa [#allocation4 + $0x1], 0 }
  0x14   :  { %29 = vsyncpa [#allocation7], 0 }
  0x15   :  { %31 = vsyncpa [#allocation7 + $0x1], 0 }
  0x16   :  { %32 = vsyncpa [#allocation10], 0 }
  0x17   :  { %33 = vsyncpa [#allocation13], 0 }
  0x18   :  { %34 = vsyncpa [#allocation16], 0 }
  0x19   :  { %35 = vsyncpa [#allocation5], 0 }
  0x1a   :  { %37 = vsyncpa [#allocation5 + $0x1], 0 }
  0x1b   :  { %38 = vsyncpa [#allocation19], 0 }
  0x1c   :  { %40 = vsyncpa [#allocation19 + $0x1], 0  ;;  %s2357_s1 = smov 0   ;;  %s2359_s22 = smov 0  }
  0x1d   :  { %s2361_s23 = smov 0   ;;  %s2363_s24 = smov 0  }
  0x1e   :  { %s2365_s2 = smov 0   ;;  %s2367_s25 = smov 0  }
  0x1f LB: > { %2737 = sst [smem:[#allocation29_spill]] %s2222_s1  ;;  %s2388_s3 = sadd.s32 4294967295, %s2242_s25   ;;  %s2242_s25 = sphi %s2367_s25, %s46_s25   ;;  %s2238_s2 = sphi %s2365_s2, %s2773_s2   ;;  %s2234_s24 = sphi %s2363_s24, %s2772_s24   ;;  %s2230_s23 = sphi %s2361_s23, %s2771_s23   ;;  %s2226_s22 = sphi %s2359_s22, %s2775_s22   ;;  %s2222_s1 = sphi %s2357_s1, %s2774_s1  }
  0x20   : > { %2738 = sst [smem:[#allocation30_spill]] %s2230_s23  ;;  %p1568_p0 = scmp.ge.s32.totalorder %s2242_s25, 1 }
  0x21   : > { %2739 = sst [smem:[#allocation31_spill]] %s2238_s2  ;;  %p79_p1 = scmp.eq.s32.totalorder %s2388_s3, 0 }
  0x22   : > { %p551_p2 = scmp.lt.s32.totalorder %s2242_s25, 3  ;;  %s2740_s28 = sld [smem:[#allocation38_spill]] }
  0x23   : > { %s2244_s30 = smov [#allocation8]   ;;  %p1577_p6 = scmp.ge.s32.totalorder %s2242_s25, 2 }
  0x24   : > { %p2396_p3 = pnand %p1568_p0, %p551_p2  ;;  %s567_s0 = sshll.u32 %s2244_s30, 4  ;;  %s568_s0 = int_to_ptr.vmem [resolvable:$true] %s567_s0 }
  0x25   : > { %s2743_s5 = sld [smem:[#allocation40_spill]]  ;;  %s2245_s16 = smov 64  }
  0x26   : > { %p1726_p4 = pneg %p2396_p3  ;;  %s2246_s15 = smov 4  }
  0x27   : > { %s2247_s30 = smov [#allocation9]   ;;  %s2744_s8 = sld [smem:[#allocation42_spill]] }
  0x28   : > { %s565_s4 = sshll.u32 %s2740_s28, 4  ;;  %p2404_p5 = pnand %p1726_p4, %p79_p1  ;;  %s566_s4 = int_to_ptr.hbm [resolvable:$true] %s565_s4 }
  0x29   : > { %s584_s19 = sshll.u32 %s2247_s30, 4  ;;  %s2745_s7 = sld [smem:[#allocation41_spill]]  ;;  %s585_s19 = int_to_ptr.vmem [resolvable:$true] %s584_s19 }
  0x2a   : > { %1729 = dma.hbm_to_vmem [thread:$0]  (!%p2404_p5), %s566_s4, 256, %s568_s0, [#allocation7], %s2245_s16, %s2245_s16, %s2246_s15  }
  0x2b   : > { %s582_s28 = sshll.u32 %s2743_s5, 4  ;;  %s2248_s13 = smov [#allocation12]   ;;  %s583_s28 = int_to_ptr.hbm [resolvable:$true] %s582_s28 }
  0x2c   : > { %1732 = dma.hbm_to_vmem [thread:$0]  (!%p2404_p5), %s583_s28, 256, %s585_s19, [#allocation10], %s2245_s16, %s2245_s16, %s2246_s15  }
  0x2d   : > { %s613_s20 = sshll.u32 %s2744_s8, 4  ;;  %s615_s4 = sshll.u32 %s2248_s13, 4  ;;  %s614_s20 = int_to_ptr.hbm [resolvable:$true] %s613_s20  ;;  %s616_s4 = int_to_ptr.vmem [resolvable:$true] %s615_s4 }
  0x2e   : > { %1738 = dma.hbm_to_vmem [thread:$0]  (!%p2404_p5), %s614_s20, 256, %s616_s4, [#allocation13], %s2245_s16, %s2245_s16, %s2246_s15  }
  0x2f   : > { %s599_s5 = sshll.u32 %s2745_s7, 4  ;;  %s2249_s17 = smov [#allocation11]   ;;  %s600_s5 = int_to_ptr.hbm [resolvable:$true] %s599_s5 }
  0x30   : > { %s601_s18 = sshll.u32 %s2249_s17, 4  ;;  %s2746_s10 = sld [smem:[#allocation43_spill]]  ;;  %s602_s18 = int_to_ptr.vmem [resolvable:$true] %s601_s18 }
  0x31   : > { %1735 = dma.hbm_to_vmem [thread:$0]  (!%p2404_p5), %s600_s5, 256, %s602_s18, [#allocation10], %s2245_s16, %s2245_s16, %s2246_s15  }
  0x32   : > { %s2747_s12 = sld [smem:[#allocation44_spill]]  ;;  %s2250_s26 = smov [#allocation14]  }
  0x33   : > { %s632_s27 = sshll.u32 %s2250_s26, 4  ;;  %s2251_s4 = smov [#allocation15]   ;;  %s633_s27 = int_to_ptr.vmem [resolvable:$true] %s632_s27 }
  0x34   : > { %s649_s5 = sshll.u32 %s2251_s4, 4  ;;  %s2713_s17 = sadd.s32 4294967294, %s2242_s25   ;;  %s650_s5 = int_to_ptr.vmem [resolvable:$true] %s649_s5 }
  0x35   : > { %s58_s18 = sadd.s32 1, %s2238_s2  ;;  %s65_s0 = sadd.s32 1, %s2230_s23 }
  0x36   : > { %s630_s28 = sshll.u32 %s2746_s10, 4  ;;  %p60_p7 = scmp.ge.s32.totalorder %s58_s18, 2  ;;  %s631_s28 = int_to_ptr.hbm [resolvable:$true] %s630_s28 }
  0x37   : > { %1741 = dma.hbm_to_vmem [thread:$0]  (!%p2404_p5), %s631_s28, 256, %s633_s27, [#allocation13], %s2245_s16, %s2245_s16, %s2246_s15  }
  0x38   : > { %s647_s30 = sshll.u32 %s2747_s12, 4  ;;  %p72_p8 = scmp.ne.s32.totalorder %s2230_s23, %s2226_s22  ;;  %s648_s30 = int_to_ptr.hbm [resolvable:$true] %s647_s30 }
  0x39   : > { %1744 = dma.hbm_to_vmem [thread:$0]  (!%p2404_p5), %s648_s30, 256, %s650_s5, [#allocation16], %s2245_s16, %s2245_s16, %s2246_s15  }
  0x3a   : > { %p73_p9 = scmp.eq.s32.totalorder %s2242_s25, 0  ;;  %s2777_s18 = smov (%p60_p7, %s58_s18), 0 }
  0x3b   : > { %2748 = sst [smem:[#allocation32_spill]] %s2777_s18  ;;  %p78_p11 = scmp.ne.s32.totalorder %s2226_s22, %s2222_s1 }
  0x3c   : > { %p2462_p10 = por %p73_p9, %p72_p8  ;;  %s62_s19 = ssub.s32 %s2238_s2, %s2777_s18 }
  0x3d   : > { %p460_p12 = scmp.eq.s32.totalorder %s2388_s3, 1  ;;  %p63_p13 = scmp.eq.s32.totalorder %s62_s19, 0 }
  0x3e   : > { %p2473_p0 = por %p79_p1, %p78_p11  ;;  %p466_p4 = scmp.eq.s32.totalorder %s2713_s17, 1 }
  0x3f   : > { %p2477_p2 = por %p460_p12, %p72_p8  ;;  %p1768_p7 = scmp.lt.s32.totalorder %s2242_s25, 2 }
  0x40   : > { %s2484_s28 = scalar_select %p63_p13, %s2230_s23, %s65_s0  }
  0x41   : > { %p2486_p5 = por %p466_p4, %p78_p11  ;;  %s679_s20 = sand.u32 1, %s2230_s23  }
  0x42   : > { %2752 = sst [smem:[#allocation33_spill]] %s2484_s28  ;;  %s1579_s30 = sshll.u32 %s2238_s2, 2 }
  0x43   : > { %s2753_s13 = scalar_select %p2486_p5, 1, 0 }
  0x44   : > { %s1578_s26 = sshll.u32 %s679_s20, 2  ;;  %s2755_s5 = sld [smem:[#allocation35_spill]] }
  0x45   : > { %2754 = sst [smem:[#allocation34_spill]] %s2753_s13  ;;  %s683_s8 = scalar_lea.vmem [#allocation3], %s1578_s26 }
  0x46   : > { %s691_s10 = sshll.u32 %s683_s8, 4  ;;  %p1746_p8 = pnand %p1768_p7, %p2462_p10  ;;  %s692_s10 = int_to_ptr.vmem [resolvable:$true] %s691_s10 }
  0x47   : > { %s2756_s12 = sld [smem:[#allocation36_spill]]  ;;  %s698_s28 = sand.u32 1, %s2242_s25  }
  0x48   : > { %s680_s13 = scalar_lea.sflag [#allocation4], %s679_s20  ;;  %s702_s23 = scalar_lea.vmem [#allocation6], %s1578_s26 }
  0x49   : > { %s710_s1 = sshll.u32 %s702_s23, 4  ;;  %s699_s27 = scalar_lea.sflag [#allocation7], %s698_s28  ;;  %s711_s1 = int_to_ptr.vmem [resolvable:$true] %s710_s1 }
  0x4a   : > { %s687_s19 = scalar_lea.hbm %s2755_s5, %s1579_s30  ;;  %s2505_s8 = sand.u32 (!%p2396_p3), 1, %s2226_s22  }
  0x4b   : > { %s689_s7 = sshll.u32 %s687_s19, 4  ;;  %719 = sbr.rel (%p2396_p3) target bundleno = 663 (0x297), region = 84  ;;  %s690_s7 = int_to_ptr.hbm [resolvable:$true] %s689_s7 }
  0x4c   : > { %1748 = dma.hbm_to_vmem [thread:$0]  (!%p1746_p8), %s690_s7, 64, %s692_s10, %s680_s13  }
  0x4d   : > { %s706_s18 = scalar_lea.hbm %s2756_s12, %s1579_s30  ;;  %s1583_s12 = sshll.u32 (!%p2396_p3), %s2505_s8, 2 }
  0x4e   : > { %s708_s2 = sshll.u32 %s706_s18, 4  ;;  %s722_s17 = scalar_lea.sflag (!%p2396_p3), [#allocation4], %s2505_s8  ;;  %s709_s2 = int_to_ptr.hbm [resolvable:$true] %s708_s2 }
  0x4f   : > { %1751 = dma.hbm_to_vmem [thread:$0]  (!%p1746_p8), %s709_s2, 64, %s711_s1, %s699_s27  }
  0x50   : > { %s725_s21 = scalar_lea.vmem [#allocation3], %s1583_s12 }
  0x51   : > { %2189 = dma.done.wait (%p2473_p0), %s722_s17, 64  }
  0x52   : > { %2191 = vsyncadd (%p2473_p0), %s722_s17, 4294967232  ;;  %s731_s7 = sand.u32 1, %s2388_s3   ;;  %s735_s1 = scalar_lea.vmem [#allocation6], %s1583_s12 }
  0x53   : > { %s732_s10 = scalar_lea.sflag [#allocation7], %s731_s7 }
  0x54   : > { %2193 = dma.done.wait (%p2473_p0), %s732_s10, 64  }
  0x55   : > { %2195 = vsyncadd (%p2473_p0), %s732_s10, 4294967232 }
  0x56   : > { %2197 = dma.done.wait (%p79_p1), [#allocation7], 256  }
  0x57   : > { %2199 = vsyncadd (%p79_p1), [#allocation7], 4294967040 }
  0x58   : > { %2201 = dma.done.wait (%p79_p1), [#allocation10], 512  }
  0x59   : > { %2203 = vsyncadd (%p79_p1), [#allocation10], 4294966784 }
  0x5a   : > { %2205 = dma.done.wait (%p79_p1), [#allocation13], 512  }
  0x5b   : > { %2207 = vsyncadd (%p79_p1), [#allocation13], 4294966784 }
  0x5c   : > { %2209 = dma.done.wait (%p79_p1), [#allocation16], 256  }
  0x5d   : > { %2211 = vsyncadd (%p79_p1), [#allocation16], 4294967040  ;;  %v1679_v0 = vld [vmem:[#allocation8 + $0x8] sm:$0xff]  ;;  %s2757_s29 = sld [smem:[#allocation37_spill]]  ;;  %v1678_v2 = vld [vmem:[#allocation8] sm:$0xff]  ;;  %vm901_vm0 = vcmask 261120  }
  0x5e   : > { %911 = vmatpush.bf16.msra.mxu0 %v1679_v0  ;;  %v1685_v4 = vld [vmem:[#allocation12 + $0x8] sm:$0xff]  ;;  %v1684_v5 = vld [vmem:[#allocation12] sm:$0xff]  ;;  %v1683_v6 = vld [vmem:[#allocation11 + $0x8] sm:$0xff]  ;;  %s2758_s20 = sld [smem:[#allocation39_spill]]  ;;  %s2558_s19 = sshll.u32 %s2505_s8, 3  ;;  %vm1129_vm1 = vcmask 257024  }
  0x5f   : > { %1015 = vmatpush.bf16.msra.mxu3 %v1685_v4  ;;  %v880_v7 = vld [vmem:[%s735_s1] sm:$0xf]  ;;  %v879_v8 = vld [vmem:[%s725_s21] sm:$0xf]  ;;  %v1682_v9 = vld [vmem:[#allocation11] sm:$0xff]  ;;  %s835_s0 = scalar_lea.vmem [#allocation17], %s2558_s19 }
  0x60   : > { %v1681_v10 = vld [vmem:[#allocation9 + $0x8] sm:$0xff]  ;;  %v1680_v11 = vld [vmem:[#allocation9] sm:$0xff]  ;;  %v1687_v12 = vld [vmem:[#allocation14 + $0x8] sm:$0xff]  ;;  %s842_s17 = scalar_lea.vmem [#allocation18], %s2558_s19  ;;  %s2759_s15 = sld [smem:[#allocation45_spill]]  ;;  %vm1150_vm5 = vcmask 7168  }
  0x61   : > { %982 = vmatpush.bf16.msra.mxu2 %v1681_v10  ;;  %v1686_v13 = vld [vmem:[#allocation14] sm:$0xff]  ;;  %v1689_v14 = vld [vmem:[#allocation15 + $0x8] sm:$0xff]  ;;  %v1688_v15 = vld [vmem:[#allocation15] sm:$0xff]  ;;  %p863_p1 = scmp.lt.s32.totalorder %s2234_s24, 1  ;;  %s2760_s26 = sld [smem:[#allocation51_spill]] }
  0x62   : > { %912 = vmatpush.bf16.msra.mxu0 %v1678_v2  ;;  %v1833_v26 = vld [vmem:[%s2697_s9] ss:$0 sm:$0xff]  ;;  %v1691_v45 = vld [vmem:[%s2702_s14 + $0x8] sm:$0xff]  ;;  %s849_s5 = scalar_lea.vmem [#allocation20], %s2558_s19  ;;  %s2598_s27 = sshll.u32 %s2234_s24, 3 }
  0x63   : > { %v1677_v1 = vld [vmem:[%s2757_s29 + $0x8] sm:$0xff]  ;;  %v1676_v3 = vld [vmem:[%s2757_s29] sm:$0xff]  ;;  %1016 = vmatpush.bf16.msra.mxu3 %v1684_v5  ;;  %s2584_s28 = scalar_select %p863_p1, %s2234_s24, 1 }
  0x64   : > { %939 = vmatpush.bf16.msra.mxu1 %v1677_v1  ;;  %v1832_v16 = vld [vmem:[%s2758_s20] ss:$0 sm:$0xff]  ;;  %s2761_s10 = sld [smem:[#allocation49_spill]]  ;;  %s1243_s23 = sshll.u32 %s842_s17, 4  ;;  %s1244_s23 = int_to_ptr.vmem [resolvable:$true] %s1243_s23 }
  0x65   : > { %1604 = vmatmul.msk.bf16.vlgmr.msra.gmra.mxu0 %vm901_vm0, %v880_v7  ;;  %983 = vmatpush.bf16.msra.mxu2 %v1680_v11  ;;  %v1834_v34 = vld [vmem:[%s2694_s6] ss:$0 sm:$0xff]  ;;  %s2719_s13 = sshll.u32 %s2584_s28, 3  ;;  %s2762_s20 = sld [smem:[#allocation48_spill]] }
  0x66   : > { %1040 = vmatpush.bf16.msrb.mxu0 %v1683_v6  ;;  %1631 = vmatmul.msk.bf16.vlgmr.msra.gmra.mxu3 %vm901_vm0, %v880_v7  ;;  %v1835_v38 = vld [vmem:[%s2699_s11] ss:$0 sm:$0xff] }
  0x67   : > { %1183 = vmatpush.bf16.msrb.mxu3 %v1691_v45  ;;  %v1690_v46 = vld [vmem:[%s2702_s14] sm:$0xff]  ;;  %s873_s4 = scalar_lea.vmem %s2760_s26, %s2719_s13  ;;  %s2612_s26 = scalar_lea.sflag [#allocation19], %s731_s7 }
  0x68   : > { %940 = vmatpush.bf16.msra.mxu1 %v1676_v3  ;;  %v1836_v48 = vld [vmem:[%s2759_s15] ss:$0 sm:$0xff] }
  0x69   : > { %1120 = vmatpush.bf16.msrb.mxu2 %v1689_v14 }
  0x6a   : > { %1041 = vmatpush.bf16.msrb.mxu0 %v1682_v9  ;;  %s1241_s1 = scalar_lea.hbm %s2761_s10, %s2598_s27 }
  0x6b   : > { %1613 = vmatmul.msk.bf16.vlgmr.msra.gmra.mxu1 %vm901_vm0, %v879_v8  ;;  %1184 = vmatpush.bf16.msrb.mxu3 %v1690_v46  ;;  %s1245_s2 = sshll.u32 %s1241_s1, 4  ;;  %s1227_s30 = scalar_lea.hbm %s2762_s20, %s2598_s27  ;;  %s1246_s2 = int_to_ptr.hbm [resolvable:$true] %s1245_s2 }
  0x6c   : > { %1083 = vmatpush.bf16.msrb.mxu1 %v1687_v12  ;;  %s2094_s24 = sshra.s32 %s1246_s2, 4  ;;  %s2095_s24 = int_to_ptr.hbm [resolvable:$true] %s2094_s24 }
  0x6d   : > { %1121 = vmatpush.bf16.msrb.mxu2 %v1688_v15  ;;  %p2101_p11 = scmp.lt.s32.totalorder %s2095_s24, %s2761_s10 }
  0x70   : > { %1084 = vmatpush.bf16.msrb.mxu1 %v1686_v13 }
  0x75   : > { %1640 = vmatmul.msk.bf16.vlgmr.msrb.gmra.mxu0 %vm901_vm0, %v879_v8 }
  0xe2   : > { %v914_v17 = vpop.f32.mrf.mxu0 }
  0xe8   : > { %v942_v18 = vpop.f32.mrf.mxu1 }
  0xe9   : > { %v943_v19 = vadd.f32 %v942_v18, %v914_v17  ;;  %v1018_v25 = vpop.f32.mrf.mxu3 }
  0xea   : > { %v916_v23 = vpop.f32.mrf.mxu0 }
  0xeb   : > { %v950_v20 = vadd.f32 %v1832_v16, %v943_v19 }
  0xed   : > { %v951_v21 = vmax.f32 %v950_v20, 0.0 }
  0xef   : > { %v952_v22 = vpack.c.bf16 %v951_v21, %v951_v21 }
  0xf0   : > { %v944_v24 = vpop.f32.mrf.mxu1 }
  0xf1   : > { %1622 = vmatmul.msk.bf16.vlgmr.msra.gmra.mxu2 %vm901_vm0, %v952_v22  ;;  %v1020_v29 = vpop.f32.mrf.mxu3 }
  0xf2   : > { %v1043_v27 = vpop.f32.mrf.mxu0 }
  0xf3   : > { %v1044_v28 = vadd.f32 %v1043_v27, %v1018_v25 }
  0xf5   : > { %v1051_v30 = vadd.f32 %v1833_v26, %v1044_v28 }
  0xf7   : > { %v1052_v31 = vmax.f32 %v1051_v30, 0.0 }
  0xf9   : > { %v1053_v32 = vpack.c.bf16 %v1052_v31, %v1052_v31 }
  0xfa   : > { %v1045_v33 = vpop.f32.mrf.mxu0 }
  0xfb   : > { %1649 = vmatmul.msk.bf16.vlgmr.msrb.gmra.mxu1 %vm901_vm0, %v1053_v32 }
 0x174   : > { %v985_v35 = vpop.f32.mrf.mxu2 }
 0x175   : > { %v986_v36 = vadd.f32 %v1834_v34, %v985_v35 }
 0x177   : > { %v1090_v37 = vpack.c.bf16 %v986_v36, %v986_v36  ;;  %1145 = vst.msk [vmem:[%s835_s0] sm:$0xff] %vm901_vm0, %v986_v36 }
 0x178   : > { %v1086_v40 = vpop.f32.mrf.mxu1 }
 0x179   : > { %1658 = vmatmul.msk.bf16.vlgmr.msrb.gmra.mxu2 %vm901_vm0, %v1090_v37  ;;  %v1087_v41 = vadd.f32 %v1835_v38, %v1086_v40 }
 0x17b   : > { %v1131_v42 = vmul.f32 %v1087_v41, %v1087_v41  ;;  %1146 = vst.msk [vmem:[%s842_s17] sm:$0xff] %vm901_vm0, %v1087_v41  ;;  %s2100_s17 = scalar_lea.hbm %s2761_s10, 16 }
 0x17c   : > { %v987_v39 = vpop.f32.mrf.mxu2 }
 0x17d   : > { %v1132_v43 = vsel %vm901_vm0, %v1131_v42, 0.0 }
 0x17e   : > { %1133 = vadd.xlane.f32.xlu0 %v1132_v43 }
 0x180   : > { %v1088_v44 = vpop.f32.mrf.mxu1 }
 0x1f1   : > { %v1134_v47 = vpop.xlane.xlu0 %1133 }
 0x1f2   : > { %1838 = vrsqrt.f32 %v1134_v47  ;;  %vm1141_vm2 = vweird.f32 %v1134_v47 }
 0x1f8   : > { %v1839_v51 = vpop.eup %1838 }
 0x1f9   : > { %v1136_v52 = vmul.f32 %v1839_v51, %v1134_v47  ;;  %vm1142_vm3 = vweird.f32 %v1839_v51 }
 0x1fa   : > { %vm1143_vm4 = vmor %vm1141_vm2, %vm1142_vm3 }
 0x1fb   : > { %v1137_v54 = vmul.f32 %v1839_v51, %v1136_v52 }
 0x1fc   : > { %v1123_v49 = vpop.f32.mrf.mxu2 }
 0x1fd   : > { %v1124_v50 = vadd.f32 %v1836_v48, %v1123_v49  ;;  %v1138_v56 = vmul.f32 0.5, %v1137_v54 }
 0x1ff   : > { %v1127_v53 = vmax.f32 %v1124_v50, 0.0  ;;  %v1139_v58 = vsub.f32 1.5, %v1138_v56 }
 0x201   : > { %v1128_v55 = vpack.c.bf16 %v1127_v53, %v1127_v53  ;;  %v1140_v59 = vmul.f32 %v1839_v51, %v1139_v58 }
 0x203   : > { %1130 = vst.msk [vmem:[#allocation2] sm:$0xf] %vm1129_vm1, %v1128_v55  ;;  %v1144_v60 = vsel %vm1143_vm4, %v1839_v51, %v1140_v59 }
 0x204   : > { %v1125_v57 = vpop.f32.mrf.mxu2  ;;  %v1147_v61 = vmul.f32 %v1144_v60, %v1087_v41  ;;  %v1149_v62 = vmul.f32 %v1144_v60, %v1134_v47 }
 0x206   : > { %1151 = vst.msk [vmem:[%s873_s4] sm:$0xff] %vm1150_vm5, %v1149_v62  ;;  %s2096_s4 = scalar_lea.hbm %s2095_s24, 8 }
 0x207   : > { %1148 = vst.msk [vmem:[%s849_s5] sm:$0xff] %vm901_vm0, %v1147_v61  ;;  %p2097_p3 = scmp.ne.s32.totalorder %s2095_s24, %s2096_s4  ;;  %p2102_p12 = scmp.lt.s32.totalorder %s2100_s17, %s2096_s4 }
 0x209   : > { %p2098_p9 = pnand %p2097_p3, %p2477_p2  ;;  %p2103_p13 = por %p2102_p12, %p2101_p11 }
 0x20a   : > { %v1152_v63 = vld [vmem:[#allocation2] sm:$0xf] }
 0x20b   : > { %1667 = vmatmul.msk.bf16.vlgmr.msrb.gmra.mxu3 %vm901_vm0, %v1152_v63  ;;  %p2099_p10 = pneg %p2098_p9 }
 0x20d   : > { %p2104_p0 = pnand %p2103_p13, %p2099_p10 }
 0x20f   : > { %2107 = shalt.err (!%p2104_p0)
}
 0x210   : > { %1721 = dma.vmem_to_hbm [thread:$0]  (%p2477_p2), %s1244_s23, 128, %s1246_s2, %s2612_s26  }
 0x211   : > { %s1229_s3 = sshll.u32 %s835_s0, 4  ;;  %s1231_s7 = sshll.u32 %s1227_s30, 4  ;;  %s1230_s3 = int_to_ptr.vmem [resolvable:$true] %s1229_s3  ;;  %s1232_s7 = int_to_ptr.hbm [resolvable:$true] %s1231_s7 }
 0x212   : > { %s2763_s15 = sld [smem:[#allocation50_spill]]  ;;  %s1200_s4 = scalar_lea.sflag [#allocation5], %s2505_s8 }
 0x213   : > { %s2122_s12 = sshra.s32 %s1232_s7, 4  ;;  %s2128_s23 = scalar_lea.hbm %s2762_s20, 16  ;;  %s2123_s12 = int_to_ptr.hbm [resolvable:$true] %s2122_s12 }
 0x214   : > { %s2124_s21 = scalar_lea.hbm %s2123_s12, 8  ;;  %p2129_p1 = scmp.lt.s32.totalorder %s2123_s12, %s2762_s20 }
 0x215   : > { %p2125_p4 = scmp.ne.s32.totalorder %s2123_s12, %s2124_s21  ;;  %p2130_p3 = scmp.lt.s32.totalorder %s2128_s23, %s2124_s21 }
 0x217   : > { %p2126_p7 = pnand %p2125_p4, %p2477_p2  ;;  %p2131_p9 = por %p2130_p3, %p2129_p1 }
 0x218   : > { %s1255_s24 = scalar_lea.hbm %s2763_s15, %s2598_s27 }
 0x219   : > { %p2127_p8 = pneg %p2126_p7 }
 0x21b   : > { %p2132_p10 = pnand %p2131_p9, %p2127_p8 }
 0x21d   : > { %2135 = shalt.err (!%p2132_p10)
}
 0x21e   : > { %1720 = dma.vmem_to_hbm [thread:$0]  (%p2477_p2), %s1230_s3, 128, %s1232_s7, %s1200_s4  }
 0x21f   : > { %s1257_s8 = sshll.u32 %s849_s5, 4  ;;  %s1259_s27 = sshll.u32 %s1255_s24, 4  ;;  %s1258_s8 = int_to_ptr.vmem [resolvable:$true] %s1257_s8  ;;  %s1260_s27 = int_to_ptr.hbm [resolvable:$true] %s1259_s27 }
 0x220   : > { %s2150_s30 = sshra.s32 %s1260_s27, 4  ;;  %s2156_s21 = scalar_lea.hbm %s2763_s15, 16  ;;  %s2151_s30 = int_to_ptr.hbm [resolvable:$true] %s2150_s30 }
 0x221   : > { %s2152_s18 = scalar_lea.hbm %s2151_s30, 8  ;;  %p2157_p0 = scmp.lt.s32.totalorder %s2151_s30, %s2763_s15 }
 0x222   : > { %p2153_p11 = scmp.ne.s32.totalorder %s2151_s30, %s2152_s18  ;;  %p2158_p4 = scmp.lt.s32.totalorder %s2156_s21, %s2152_s18 }
 0x224   : > { %p2154_p12 = pnand %p2153_p11, %p2477_p2  ;;  %p2159_p7 = por %p2158_p4, %p2157_p0 }
 0x226   : > { %p2155_p13 = pneg %p2154_p12 }
 0x228   : > { %p2160_p8 = pnand %p2159_p7, %p2155_p13 }
 0x22a   : > { %2163 = shalt.err (!%p2160_p8)
}
 0x22b   : > { %1722 = dma.vmem_to_hbm [thread:$0]  (%p2477_p2), %s1258_s8, 128, %s1260_s27, %s2612_s26   ;;  %vm1190_vm6 = vcmask 64512  }
 0x22c   : > { %s2764_s3 = sld [smem:[#allocation46_spill]]  ;;  %s2765_s7 = sshll.u32 %s2584_s28, 3 }
 0x22d   : > { %s2766_s23 = sld [smem:[#allocation47_spill]] }
 0x232   : > { %v1837_v0 = vld [vmem:[%s2764_s3] ss:$0 sm:$0xff] }
 0x233   : > { %s869_s0 = scalar_lea.vmem %s2766_s23, %s2765_s7 }
 0x28e   : > { %v1186_v1 = vpop.f32.mrf.mxu3 }
 0x28f   : > { %v1187_v2 = vadd.f32 %v1837_v0, %v1186_v1 }
 0x291   : > { %1191 = vst.msk [vmem:[%s869_s0] sm:$0xff] %vm1190_vm6, %v1187_v2 }
 0x296   : > { %v1188_v3 = vpop.f32.mrf.mxu3 }
 0x297 PF: > { %s2767_s2 = sld [smem:[#allocation29_spill]]  ;;  %p1753_p2 = pnand %p1577_p6, %p2486_p5 }
 0x299   : > { %p1754_p1 = pneg %p1753_p2 }
 0x29d   : > { %s1284_s30 = sand.u32 1, %s2767_s2  }
 0x29e   : > { %s1285_s26 = scalar_lea.sflag [#allocation5], %s1284_s30 }
 0x29f   : > { %2213 = dma.done.wait (%p1754_p1), %s1285_s26, 128  }
 0x2a0   : > { %2215 = vsyncadd (%p1754_p1), %s1285_s26, 4294967168  ;;  %s2769_s28 = sadd.s32 4294967294, %s2242_s25  }
 0x2a1   : > { %s1294_s8 = sand.u32 1, %s2769_s28  }
 0x2a2   : > { %s1295_s27 = scalar_lea.sflag [#allocation19], %s1294_s8 }
 0x2a3   : > { %2217 = dma.done.wait (%p1754_p1), %s1295_s27, 256  }
 0x2a4   : > { %2219 = vsyncadd (%p1754_p1), %s1295_s27, 4294967040  ;;  %s46_s25 = sadd.s32 1, %s2242_s25   ;;  %s2770_s18 = sld [smem:[#allocation30_spill]] }
 0x2a5   : > { %p43_p3 = scmp.ge.s32.totalorder %s46_s25, 4   ;;  %s2771_s23 = sld [smem:[#allocation33_spill]] }
 0x2a6   : > { %s2772_s24 = sld [smem:[#allocation31_spill]]  ;;  %s2774_s1 = smov %s2226_s22 }
 0x2a7   : > { %s2773_s2 = sld [smem:[#allocation32_spill]]  ;;  %45 = sbr.rel (!%p43_p3) target bundleno = 31 (0x1f), region = 232 }
 0x2aa   : > { %s2775_s22 = smov %s2770_s18 }
 0x2ac   :  { %1318 = vsyncpa [#allocation4], 1 }
 0x2ad   :  { %1320 = vsyncpa [#allocation4 + $0x1], 1 }
 0x2ae   :  { %1321 = vsyncpa [#allocation7], 1 }
 0x2af   :  { %1323 = vsyncpa [#allocation7 + $0x1], 1 }
 0x2b0   :  { %1324 = vsyncpa [#allocation10], 1 }
 0x2b1   :  { %1325 = vsyncpa [#allocation13], 1 }
 0x2b2   :  { %1326 = vsyncpa [#allocation16], 1 }
 0x2b3   :  { %1327 = vsyncpa [#allocation5], 1 }
 0x2b4   :  { %1329 = vsyncpa [#allocation5 + $0x1], 1 }
 0x2b5   :  { %1330 = vsyncpa [#allocation19], 1 }
 0x2b6   :  { %1332 = vsyncpa [#allocation19 + $0x1], 1 }

</bundles_post_ra>
